<compile_context>
chip_gen: v6e
topology: v6e:2x2x1
jax: 0.10.0
libtpu: 0.0.40
codegen_flags: <defaults>
</compile_context>

<pallas_src>
import jax
import jax.numpy as jnp
from jax.experimental import pallas as pl
from jax.experimental.pallas import tpu as pltpu


def _round_up(x, m):
    return ((x + m - 1) // m) * m


def _proj_kernel(x_ref, w_ref, b_ref, o_ref):
    """One M-tile of the collapsed (B*t_out, D) @ (D, S_pad) projection.

    x_ref : (TM, D)      unmasked rows only (warmup rows never enter VMEM)
    w_ref : (D, S_pad)   lane-padded weight (constant index_map -> resident)
    b_ref : (1, S_pad)   lane-padded bias, f32
    o_ref : (TM, S_pad)  sublane-full, lane-dense output tile
    """
    y = jnp.dot(x_ref[...], w_ref[...], preferred_element_type=jnp.float32)
    # f32 epilogue (bias add), single cast at the end (v5e has no bf16 VPU).
    o_ref[...] = (y + b_ref[...]).astype(o_ref.dtype)


def mask_warmup_forward(x, w, b, n_unmasked_samples, *, training=False,
                        block_m=128, compute_dtype=None, pad_lanes=True):
    """Pallas equivalent of MaskWarmupWrapper.forward.

    training=True  -> model(x)                      (full time axis)
    training=False -> model(x)[:, -n_unmasked:, :]  (tail only, warmup never DMA'd)

    compute_dtype: pass jnp.bfloat16 on v6e/v7x to halve input HBM traffic
                   (accumulation stays f32; output keeps x.dtype).
    """
    B, T, D = x.shape
    S = w.shape[-1]
    out_dtype = x.dtype

    if training:
        t_out = T
        x_sel = x                                  # full sequence (free reshape)
    else:
        n = int(n_unmasked_samples)
        if n <= 0 or n > T:
            raise ValueError(
                f"n_unmasked_samples={n} must be in [1, TIME_STEPS={T}]")
        t_out = n
        # Select the unmasked tail BEFORE the kernel: masked warmup rows are
        # never copied HBM->VMEM by the pallas pipeline.
        x_sel = x[:, T - n:, :]

    if compute_dtype is not None:
        x_sel = x_sel.astype(compute_dtype)
        w = w.astype(compute_dtype)

    # ---- Collapse (B, t_out) into one large-M matmul --------------------
    M = B * t_out
    x2d = x_sel.reshape(M, D)

    # Sublane-full M tiles: TM multiple of 8 (f32 sublane), <= block_m.
    TM = min(block_m, _round_up(M, 8))
    M_pad = _round_up(M, TM)
    if M_pad != M:
        x2d = jnp.pad(x2d, ((0, M_pad - M), (0, 0)))

    # ---- Lane-dense output: pad STATE up to a multiple of 128 lanes -----
    S_pad = _round_up(S, 128) if pad_lanes else S
    b2d = b.reshape(1, S).astype(jnp.float32)
    if S_pad != S:
        w = jnp.pad(w, ((0, 0), (0, S_pad - S)))
        b2d = jnp.pad(b2d, ((0, 0), (0, S_pad - S)))

    grid = (M_pad // TM,)   # parallel axis -> shards across TCs on v7x megacore

    out = pl.pallas_call(
        _proj_kernel,
        out_shape=jax.ShapeDtypeStruct((M_pad, S_pad), out_dtype),
        grid=grid,
        in_specs=[
            pl.BlockSpec((TM, D),     lambda i: (i, 0)),   # unmasked rows only
            pl.BlockSpec((D, S_pad),  lambda i: (0, 0)),   # weight: resident
            pl.BlockSpec((1, S_pad),  lambda i: (0, 0)),   # bias: resident
        ],
        out_specs=pl.BlockSpec((TM, S_pad), lambda i: (i, 0)),
        compiler_params=pltpu.CompilerParams(
            dimension_semantics=("parallel",)),
    )(x2d, w, b2d)

    # Undo M / lane padding, restore (BATCH, TIME_OUT, STATE).
    return out[:M, :S].reshape(B, t_out, S)


if __name__ == "__main__":
    # Small shapes consistent with "(BATCH_SIZE, TIME_STEPS, STATE_VARIABLES)".
    B, T, D_IN, S = 2, 8, 32, 32
    N_UNMASKED = 4

    key = jax.random.PRNGKey(0)
    kx, kw, kb = jax.random.split(key, 3)
    x = jax.random.normal(kx, (B, T, D_IN), dtype=jnp.float32)
    w = jax.random.normal(kw, (D_IN, S), dtype=jnp.float32) * 0.1
    b = jax.random.normal(kb, (S,), dtype=jnp.float32) * 0.1

    # Inference path (warmup samples masked out, never DMA'd).
    out_eval = jax.block_until_ready(
        mask_warmup_forward(x, w, b, N_UNMASKED, training=False))
    # Training path (full sequence).
    out_train = jax.block_until_ready(
        mask_warmup_forward(x, w, b, N_UNMASKED, training=True))

    # Pure-JAX reference.
    ref_full = jnp.einsum("btd,ds->bts", x, w) + b
    ref_eval = ref_full[:, -N_UNMASKED:, :]

    assert out_train.shape == (B, T, S)
    assert out_eval.shape == (B, N_UNMASKED, S)
    assert jnp.allclose(out_train, ref_full, atol=1e-5, rtol=1e-5)
    assert jnp.allclose(out_eval, ref_eval, atol=1e-5, rtol=1e-5)

    # Larger case: exercises M tiling (grid > 1), M padding and lane padding.
    B2, T2, D2, S2, N2 = 4, 64, 128, 96, 48
    kx2, kw2, kb2 = jax.random.split(jax.random.PRNGKey(1), 3)
    x2 = jax.random.normal(kx2, (B2, T2, D2), dtype=jnp.float32)
    w2 = jax.random.normal(kw2, (D2, S2), dtype=jnp.float32) * 0.05
    b2 = jax.random.normal(kb2, (S2,), dtype=jnp.float32) * 0.05
    out2 = jax.block_until_ready(
        mask_warmup_forward(x2, w2, b2, N2, training=False))
    ref2 = (jnp.einsum("btd,ds->bts", x2, w2) + b2)[:, -N2:, :]
    assert out2.shape == (B2, N2, S2)
    assert jnp.allclose(out2, ref2, atol=1e-4, rtol=1e-4)

    # bf16 compute path (the v6e/v7x bandwidth optimization); loose tolerance.
    out_bf16 = jax.block_until_ready(
        mask_warmup_forward(x, w, b, N_UNMASKED, training=False,
                            compute_dtype=jnp.bfloat16))
    assert out_bf16.shape == (B, N_UNMASKED, S)
    assert jnp.allclose(out_bf16, ref_eval, atol=5e-2, rtol=5e-2)

    print("KERNEL_OK")
</pallas_src>

<mosaic_0001>
module attributes {stable_mosaic.version = 11 : i64} {
  func.func @_proj_kernel(%arg0: i32, %arg1: memref<8x32xf32, #tpu.memory_space<vmem>>, %arg2: memref<32x128xf32, #tpu.memory_space<vmem>>, %arg3: memref<1x128xf32, #tpu.memory_space<vmem>>, %arg4: memref<8x128xf32, #tpu.memory_space<vmem>>) attributes {dimension_semantics = [#tpu.dimension_semantics<parallel>], iteration_bounds = array<i64: 1>, scalar_prefetch = 0 : i64, scratch_operands = 0 : i64, tpu.core_type = #tpu.core_type<tc>, window_params = [{transform_indices = @transform_0, window_bounds = array<i64: 8, 32>}, {pipeline_mode = #tpu.pipeline_mode<synchronous>, transform_indices = @transform_1, window_bounds = array<i64: 32, 128>}, {pipeline_mode = #tpu.pipeline_mode<synchronous>, transform_indices = @transform_2, window_bounds = array<i64: 1, 128>}, {transform_indices = @transform_3, window_bounds = array<i64: 8, 128>}]} {
    %c0 = arith.constant 0 : index
    %c0_0 = arith.constant 0 : index
    %0 = vector.load %arg1[%c0, %c0_0] : memref<8x32xf32, #tpu.memory_space<vmem>>, vector<8x32xf32>
    %c0_1 = arith.constant 0 : index
    %c0_2 = arith.constant 0 : index
    %1 = vector.load %arg2[%c0_1, %c0_2] : memref<32x128xf32, #tpu.memory_space<vmem>>, vector<32x128xf32>
    %cst = arith.constant dense<0.000000e+00> : vector<8x128xf32>
    %2 = tpu.matmul %0, %1, %cst {dimension_numbers = #tpu.dot_dimension_numbers<[1], [0], [0], [1], [0, 0, 1, 1], [], []>} : vector<8x32xf32>, vector<32x128xf32>, vector<8x128xf32> -> vector<8x128xf32>
    %c0_3 = arith.constant 0 : index
    %c0_4 = arith.constant 0 : index
    %3 = vector.load %arg3[%c0_3, %c0_4] : memref<1x128xf32, #tpu.memory_space<vmem>>, vector<1x128xf32>
    %4 = vector.broadcast %3 : vector<1x128xf32> to vector<8x128xf32>
    %5 = arith.addf %2, %4 : vector<8x128xf32>
    %c0_5 = arith.constant 0 : index
    %c0_6 = arith.constant 0 : index
    %6 = vector.load %arg4[%c0_5, %c0_6] : memref<8x128xf32, #tpu.memory_space<vmem>>, vector<8x128xf32>
    tpu.vector_store %arg4[%c0_5, %c0_6], %5 {strides = array<i32>} : memref<8x128xf32, #tpu.memory_space<vmem>>, vector<8x128xf32>,
    return
  }
  func.func @transform_0(%arg0: i32) -> (i32, i32) {
    %c0_i32 = arith.constant 0 : i32
    %c0_i32_0 = arith.constant 0 : i32
    return %arg0, %c0_i32 : i32, i32
  }
  func.func @transform_1(%arg0: i32) -> (i32, i32) {
    %c0_i32 = arith.constant 0 : i32
    %c0_i32_0 = arith.constant 0 : i32
    %c0_i32_1 = arith.constant 0 : i32
    return %c0_i32, %c0_i32_0 : i32, i32
  }
  func.func @transform_2(%arg0: i32) -> (i32, i32) {
    %c0_i32 = arith.constant 0 : i32
    %c0_i32_0 = arith.constant 0 : i32
    %c0_i32_1 = arith.constant 0 : i32
    return %c0_i32, %c0_i32_0 : i32, i32
  }
  func.func @transform_3(%arg0: i32) -> (i32, i32) {
    %c0_i32 = arith.constant 0 : i32
    %c0_i32_0 = arith.constant 0 : i32
    return %arg0, %c0_i32 : i32, i32
  }
}

</mosaic_0001>

<bundles_post_ra>
// kernel: tpu_custom_call.1
= control target key start
LH: loop header
LB: loop body
LE: loop exit
PB: predicated region body
PF: predicated region fallthrough
CT: control target
= control target key end

     0   :  { %8 = vsyncpa [#allocation3], 0  ;;  %s274_s0 = inlined_call_operand.hbm [shape: f32[8,32], index: 0, kind: input, shape index: {}]   ;;  %s275_s1 = inlined_call_operand.hbm [shape: f32[32,128], index: 1, kind: input, shape index: {}]   ;;  %s276_s2 = inlined_call_operand.vmem [shape: f32[1,128], index: 2, kind: input, shape index: {}]   ;;  %s277_s3 = inlined_call_operand.hbm [shape: f32[8,128], index: 3, kind: output, shape index: {}]  }
   0x1   :  { %9 = vsyncpa [#allocation6], 0 }
   0x2   :  { %10 = vsyncpa [#allocation4], 0  ;;  %s235_s12 = smov [#allocation2]   ;;  %s236_s14 = smov [#allocation5]  }
   0x3   :  { %s17_s13 = sshll.u32 %s235_s12, 4  ;;  %s26_s15 = sshll.u32 %s236_s14, 4  ;;  %s18_s13 = int_to_ptr.vmem [resolvable:$true] %s17_s13  ;;  %s27_s15 = int_to_ptr.vmem [resolvable:$true] %s26_s15 }
   0x4   :  { %s177_s16 = scalar_lea.vmem %s18_s13, 128  ;;  %p182_p1 = scmp.lt.s32.totalorder %s18_s13, %s18_s13 }
   0x5   :  { %p178_p0 = scmp.ne.s32.totalorder %s18_s13, %s177_s16  ;;  %p183_p2 = scmp.lt.s32.totalorder %s177_s16, %s177_s16 }
   0x7   :  { %p184_p3 = por %p183_p2, %p182_p1 }
   0x9   :  { %p185_p4 = pnand %p184_p3, %p178_p0 }
   0xb   :  { %188 = shalt.err (!%p185_p4)
}
   0xc   :  { %20 = dma.hbm_to_vmem [thread:$0]  %s274_s0, 128, %s18_s13, [#allocation3]  }
   0xd   :  { %s197_s19 = scalar_lea.vmem %s27_s15, 512  ;;  %p202_p6 = scmp.lt.s32.totalorder %s27_s15, %s27_s15 }
   0xe   :  { %p198_p5 = scmp.ne.s32.totalorder %s27_s15, %s197_s19  ;;  %p203_p7 = scmp.lt.s32.totalorder %s197_s19, %s197_s19 }
  0x10   :  { %p204_p8 = por %p203_p7, %p202_p6 }
  0x12   :  { %p205_p9 = pnand %p204_p8, %p198_p5 }
  0x14   :  { %208 = shalt.err (!%p205_p9)
}
  0x15   :  { %s237_s20 = smov 128   ;;  %s238_s21 = smov 8  }
  0x16   :  { %32 = dma.hbm_to_vmem [thread:$0]  %s275_s1, 512, %s27_s15, [#allocation6], %s237_s20, %s237_s20, %s238_s21  }
  0x17   :  { %229 = dma.done.wait [#allocation3], 128  }
  0x18   :  { %230 = vsyncadd [#allocation3], 4294967168 }
  0x19   :  { %231 = dma.done.wait [#allocation6], 512  }
  0x1a   :  { %232 = vsyncadd [#allocation6], 4294966784  ;;  %v239_v0 = vmov 0.0   ;;  %vm240_vm0 = vmmov 0   ;;  %v45_v1 = vld [vmem:[#allocation5 + $0x18] sm:$0xff]  ;;  %v44_v2 = vld [vmem:[#allocation5 + $0x10] sm:$0xff] }
  0x1b   :  { %151 = vmatprep.subr.mxu0 %v239_v0  ;;  %159 = vmatprep.mubr.msk.f32.mxu0 %vm240_vm0, %v239_v0  ;;  %v43_v3 = vld [vmem:[#allocation5 + $0x8] sm:$0xff]  ;;  %v42_v4 = vld [vmem:[#allocation5] sm:$0xff]  ;;  %v41_v5 = vld [vmem:[#allocation2] sm:$0xff]  ;;  %vm53_vm1 = vcmask 261120   ;;  %s241_s24 = smov [#allocation7]  }
  0x1c   :  { %152 = vmatpush3.msra.mxu0 %v45_v1  ;;  %v144_v6 = vld [vmem:[%s276_s2] ss:$0 sm:$0xff]  ;;  %s134_s25 = sshll.u32 %s241_s24, 4  ;;  %s135_s25 = int_to_ptr.vmem [resolvable:$true] %s134_s25 }
  0x1d   :  { %153 = vmatprep.subr.mxu0 %v239_v0  ;;  %s209_s26 = scalar_lea.vmem %s135_s25, 128  ;;  %p214_p11 = scmp.lt.s32.totalorder %s135_s25, %s135_s25 }
  0x1e   :  { %154 = vmatpush3.msra.mxu0 %v44_v2  ;;  %p210_p10 = scmp.ne.s32.totalorder %s135_s25, %s209_s26  ;;  %p215_p12 = scmp.lt.s32.totalorder %s209_s26, %s209_s26 }
  0x1f   :  { %155 = vmatprep.subr.mxu0 %v239_v0 }
  0x20   :  { %156 = vmatpush3.msra.mxu0 %v43_v3  ;;  %p216_p13 = por %p215_p12, %p214_p11 }
  0x21   :  { %157 = vmatprep.subr.mxu0 %v239_v0 }
  0x22   :  { %158 = vmatpush3.msra.mxu0 %v42_v4  ;;  %p217_p0 = pnand %p216_p13, %p210_p10 }
  0x23   :  { %160 = vmatmul.mubr.msk.f32.vlgmr.msra.gmra.mxu0 %vm53_vm1, %v41_v5 }
  0xe3   :  { %v123_v7 = vpop.f32.mrf.mxu0 }
  0xe4   :  { %v124_v8 = vadd.f32 %v144_v6, %v123_v7 }
  0xe5   :  { %v161_v9 = vpop.f32.mrf.mxu0 }
  0xe6   :  { %127 = vst [vmem:[#allocation7] sm:$0xff] %v124_v8 }
  0xe7   :  { %220 = shalt.err (!%p217_p0)
}
  0xe8   :  { %137 = dma.vmem_to_hbm [thread:$0]  %s135_s25, 128, %s277_s3, [#allocation4]  }
  0xe9   :  { %233 = dma.done.wait [#allocation4], 128  }
  0xea   :  { %234 = vsyncadd [#allocation4], 4294967168 }
  0xeb   :  { %141 = vsyncpa [#allocation3], 1 }
  0xec   :  { %142 = vsyncpa [#allocation6], 1 }
  0xed   :  { %143 = vsyncpa [#allocation4], 1 }

</bundles_post_ra>
